<compile_context>
chip_gen: v7x
topology: tpu7x:2x2x1
jax: 0.10.0
libtpu: 0.0.40
codegen_flags: <defaults>
</compile_context>

<pallas_src>
import jax
import jax.numpy as jnp
from jax import lax
from jax.experimental import pallas as pl
from jax.experimental.pallas import tpu as pltpu

D = 128 * 3                    # fixed by the module: Linear(384,384), BN1d(384)
BN_EPS = 1e-5                  # torch BatchNorm1d default eps
DEFAULT_TILE = 2048            # rows per batch tile (multiple of 8, lane-dense D)
VMEM_LIMIT_BYTES = 48 * 1024 * 1024   # above v5e's 16 MiB scoped default, < v7x 64 MiB


# ----------------------------------------------------------------------------
# Path 1: whole batch fits in one tile -> single fused kernel (one launch).
# ----------------------------------------------------------------------------
def _fused_kernel(x_ref, w_ref, gamma_ref, beta_ref, o_ref):
    x = x_ref[...]                                                  # (B, D)
    y = jnp.dot(x, w_ref[...], preferred_element_type=jnp.float32)  # f32 MXU (deliberate)
    inv_b = 1.0 / x.shape[0]                                        # static
    mean = jnp.sum(y, axis=0, keepdims=True) * inv_b                # (1, D)
    var = jnp.sum(y * y, axis=0, keepdims=True) * inv_b - mean * mean
    scale = gamma_ref[...] * lax.rsqrt(var + BN_EPS)                # folded BN affine
    shift = beta_ref[...] - mean * scale
    y = jnp.tanh(y * scale + shift)                                 # |y| <= 1
    e = jnp.exp(y)                                                  # no max-shift needed
    denom = jnp.sum(e, axis=1, keepdims=True)                       # (B, 1)
    o_ref[...] = x * e * pl.reciprocal(denom, approx=False)


def _fused_call(x, w_t, gamma, beta):
    B = x.shape[0]
    full = lambda shape: pl.BlockSpec(shape, lambda: (0,) * len(shape))
    return pl.pallas_call(
        _fused_kernel,
        out_shape=jax.ShapeDtypeStruct((B, D), jnp.float32),
        grid=(),
        in_specs=[full((B, D)), full((D, D)), full((1, D)), full((1, D))],
        out_specs=full((B, D)),
        compiler_params=pltpu.CompilerParams(vmem_limit_bytes=VMEM_LIMIT_BYTES),
    )(x, w_t, gamma, beta)


# ----------------------------------------------------------------------------
# Path 2: batch-tiled two-pass pipeline (any B, cdiv grid + tail masking).
# ----------------------------------------------------------------------------
def _tiled_call(x, w_t, gamma, beta, tb):
    B = x.shape[0]
    nt = pl.cdiv(B, tb)            # number of batch tiles (last one may be partial)
    nt_half = pl.cdiv(nt, 2)       # tiles per "core" slice of the stats pass

    # ---- Pass 1: per-feature sum / sum-of-squares of y = x @ W -------------
    # grid = (core_slice, tile).  Each core slice accumulates into its own
    # (2, D) slab: row 0 = sum, row 1 = sumsq.  Tail rows (and whole tiles
    # past nt when nt is odd) are masked to zero with a select before the
    # matmul, so stale padding in partial blocks cannot contaminate the stats.
    def stats_kernel(x_ref, w_ref, stats_ref):
        c = pl.program_id(0)
        i = pl.program_id(1)

        @pl.when(i == 0)
        def _():
            stats_ref[...] = jnp.zeros_like(stats_ref)

        t = c * nt_half + i                                   # logical tile id (may be >= nt)
        row_ids = t * tb + lax.broadcasted_iota(jnp.int32, (tb, 1), 0)
        xt = jnp.where(row_ids < B, x_ref[...], 0.0)          # mask tail / overflow tiles
        y = jnp.dot(xt, w_ref[...], preferred_element_type=jnp.float32)
        s = jnp.sum(y, axis=0, keepdims=True)                 # (1, D)
        sq = jnp.sum(y * y, axis=0, keepdims=True)            # (1, D)
        stats_ref[...] += jnp.concatenate([s, sq], axis=0)    # (2, D) accumulator

    stats = pl.pallas_call(
        stats_kernel,
        out_shape=jax.ShapeDtypeStruct((2, 2, D), jnp.float32),
        grid=(2, nt_half),
        in_specs=[
            # Clamp the tile index so the overflow step (odd nt) re-reads the
            # last real tile; its contribution is fully masked in-kernel.
            pl.BlockSpec((tb, D),
                         lambda c, i: (jnp.minimum(c * nt_half + i, nt - 1), 0)),
            pl.BlockSpec((D, D), lambda c, i: (0, 0)),          # W resident
        ],
        out_specs=pl.BlockSpec((None, 2, D), lambda c, i: (c, 0, 0)),
        compiler_params=pltpu.CompilerParams(
            dimension_semantics=("parallel", "arbitrary"),
            vmem_limit_bytes=VMEM_LIMIT_BYTES),
    )(x, w_t)

    # ---- Tiny host-side combine + BN fold (hoisted out of the tile loop) ---
    tot = stats[0] + stats[1]                                  # (2, D)
    mean = tot[0:1, :] * (1.0 / B)
    var = tot[1:2, :] * (1.0 / B) - mean * mean
    scale = gamma * lax.rsqrt(var + BN_EPS)                    # (1, D)
    shift = beta - mean * scale                                # (1, D)

    # ---- Pass 2: recompute the cheap matmul per tile, normalize, tanh,
    # softmax, gate.  Independent tiles -> "parallel" (megacore split). ------
    def apply_kernel(x_ref, w_ref, scale_ref, shift_ref, o_ref):
        xt = x_ref[...]                                        # (tb, D)
        y = jnp.dot(xt, w_ref[...], preferred_element_type=jnp.float32)
        y = jnp.tanh(y * scale_ref[...] + shift_ref[...])
        e = jnp.exp(y)
        denom = jnp.sum(e, axis=1, keepdims=True)
        o_ref[...] = xt * e * pl.reciprocal(denom, approx=False)

    return pl.pallas_call(
        apply_kernel,
        out_shape=jax.ShapeDtypeStruct((B, D), jnp.float32),
        grid=(nt,),
        in_specs=[
            pl.BlockSpec((tb, D), lambda i: (i, 0)),
            pl.BlockSpec((D, D), lambda i: (0, 0)),            # W resident
            pl.BlockSpec((1, D), lambda i: (0, 0)),            # scale (pinned)
            pl.BlockSpec((1, D), lambda i: (0, 0)),            # shift (pinned)
        ],
        out_specs=pl.BlockSpec((tb, D), lambda i: (i, 0)),     # partial tail masked by Pallas
        compiler_params=pltpu.CompilerParams(
            dimension_semantics=("parallel",),
            vmem_limit_bytes=VMEM_LIMIT_BYTES),
    )(x, w_t, scale, shift)


def scale_attention(x, w_t, gamma, beta, *, batch_tile=DEFAULT_TILE):
    """x: (B, 384) f32; w_t: (384, 384) = W.T; gamma/beta: (1, 384).

    Equivalent to the PyTorch module in training mode (batch statistics);
    the Linear bias is omitted because it cancels exactly under batch-mean
    subtraction.
    """
    B, dx = x.shape
    assert dx == D, f"expected feature dim {D}, got {dx}"
    tb = max(8, (int(batch_tile) + 7) // 8 * 8)                # multiple of 8 rows
    if B <= tb:
        return _fused_call(x, w_t, gamma, beta)
    return _tiled_call(x, w_t, gamma, beta, tb)


# ----------------------------------------------------------------------------
# Pure-JAX reference, faithful to the PyTorch module (INCLUDING the Linear
# bias) to demonstrate that dropping the bias in the kernel is exact.
# ----------------------------------------------------------------------------
def reference(x, w, b, gamma, beta):
    y = x @ w.T + b                                            # nn.Linear
    mean = jnp.mean(y, axis=0, keepdims=True)                  # BN training mode
    var = jnp.mean((y - mean) ** 2, axis=0, keepdims=True)     # biased variance
    y = (y - mean) / jnp.sqrt(var + BN_EPS) * gamma + beta
    y = jnp.tanh(y)
    sw = jax.nn.softmax(y, axis=1)
    return x * sw


if __name__ == "__main__":
    key = jax.random.PRNGKey(0)
    k_x1, k_x2, k_w, k_b, k_g, k_be = jax.random.split(key, 6)

    bound = 1.0 / (D ** 0.5)
    w = jax.random.uniform(k_w, (D, D), minval=-bound, maxval=bound,
                           dtype=jnp.float32)                  # (out, in), torch-style
    b = jax.random.uniform(k_b, (1, D), minval=-bound, maxval=bound,
                           dtype=jnp.float32)
    gamma = 1.0 + 0.1 * jax.random.normal(k_g, (1, D), dtype=jnp.float32)
    beta = 0.1 * jax.random.normal(k_be, (1, D), dtype=jnp.float32)

    w_t = w.T                                                  # kernel computes x @ W.T
    # NOTE: b is intentionally NOT passed to the kernel — training-mode BN
    # cancels a constant per-feature bias exactly.

    # Case 1: tiny batch -> single fused call (overhead-minimal path).
    B1 = 8
    x1 = jax.random.normal(k_x1, (B1, D), dtype=jnp.float32)
    out1 = jax.block_until_ready(scale_attention(x1, w_t, gamma, beta))
    ref1 = reference(x1, w, b, gamma, beta)
    assert out1.shape == (B1, D)
    assert jnp.allclose(out1, ref1, atol=2e-5, rtol=2e-5), "fused path mismatch"

    # Case 2: non-divisible batch with a forced small tile -> exercises the
    # cdiv grid, tail masking, the two-way stats split, and the partial
    # output block in pass 2.
    B2 = 100
    x2 = jax.random.normal(k_x2, (B2, D), dtype=jnp.float32)
    out2 = jax.block_until_ready(
        scale_attention(x2, w_t, gamma, beta, batch_tile=32))
    ref2 = reference(x2, w, b, gamma, beta)
    assert out2.shape == (B2, D)
    assert jnp.allclose(out2, ref2, atol=2e-5, rtol=2e-5), "tiled path mismatch"

    print("KERNEL_OK")
</pallas_src>

<mosaic_0001>
module attributes {stable_mosaic.version = 11 : i64} {
  func.func @_fused_kernel(%arg0: memref<8x384xf32, #tpu.memory_space<vmem>>, %arg1: memref<384x384xf32, #tpu.memory_space<vmem>>, %arg2: memref<1x384xf32, #tpu.memory_space<vmem>>, %arg3: memref<1x384xf32, #tpu.memory_space<vmem>>, %arg4: memref<8x384xf32, #tpu.memory_space<vmem>>) attributes {dimension_semantics = [], scalar_prefetch = 0 : i64, scratch_operands = 0 : i64, tpu.core_type = #tpu.core_type<tc>} {
    %c0 = arith.constant 0 : index
    %c0_0 = arith.constant 0 : index
    %0 = vector.load %arg0[%c0, %c0_0] : memref<8x384xf32, #tpu.memory_space<vmem>>, vector<8x384xf32>
    %c0_1 = arith.constant 0 : index
    %c0_2 = arith.constant 0 : index
    %1 = vector.load %arg1[%c0_1, %c0_2] : memref<384x384xf32, #tpu.memory_space<vmem>>, vector<384x384xf32>
    %cst = arith.constant dense<0.000000e+00> : vector<8x384xf32>
    %2 = tpu.matmul %0, %1, %cst {dimension_numbers = #tpu.dot_dimension_numbers<[1], [0], [0], [1], [0, 0, 1, 1], [], []>} : vector<8x384xf32>, vector<384x384xf32>, vector<8x384xf32> -> vector<8x384xf32>
    %cst_3 = arith.constant dense<0.000000e+00> : vector<384xf32>
    %3 = vector.multi_reduction <add>, %2, %cst_3 [0] : vector<8x384xf32> to vector<384xf32>
    %4 = vector.shape_cast %3 : vector<384xf32> to vector<1x384xf32>
    %cst_4 = arith.constant 1.250000e-01 : f32
    %5 = vector.broadcast %cst_4 : f32 to vector<1x384xf32>
    %6 = arith.mulf %4, %5 : vector<1x384xf32>
    %7 = arith.mulf %2, %2 : vector<8x384xf32>
    %cst_5 = arith.constant dense<0.000000e+00> : vector<384xf32>
    %8 = vector.multi_reduction <add>, %7, %cst_5 [0] : vector<8x384xf32> to vector<384xf32>
    %9 = vector.shape_cast %8 : vector<384xf32> to vector<1x384xf32>
    %cst_6 = arith.constant 1.250000e-01 : f32
    %10 = vector.broadcast %cst_6 : f32 to vector<1x384xf32>
    %11 = arith.mulf %9, %10 : vector<1x384xf32>
    %12 = arith.mulf %6, %6 : vector<1x384xf32>
    %13 = arith.subf %11, %12 : vector<1x384xf32>
    %c0_7 = arith.constant 0 : index
    %c0_8 = arith.constant 0 : index
    %14 = vector.load %arg2[%c0_7, %c0_8] : memref<1x384xf32, #tpu.memory_space<vmem>>, vector<1x384xf32>
    %cst_9 = arith.constant 9.99999974E-6 : f32
    %15 = vector.broadcast %cst_9 : f32 to vector<1x384xf32>
    %16 = arith.addf %13, %15 : vector<1x384xf32>
    %17 = math.rsqrt %16 : vector<1x384xf32>
    %18 = arith.mulf %14, %17 : vector<1x384xf32>
    %c0_10 = arith.constant 0 : index
    %c0_11 = arith.constant 0 : index
    %19 = vector.load %arg3[%c0_10, %c0_11] : memref<1x384xf32, #tpu.memory_space<vmem>>, vector<1x384xf32>
    %20 = arith.mulf %6, %18 : vector<1x384xf32>
    %21 = arith.subf %19, %20 : vector<1x384xf32>
    %22 = vector.broadcast %18 : vector<1x384xf32> to vector<8x384xf32>
    %23 = arith.mulf %2, %22 : vector<8x384xf32>
    %24 = vector.broadcast %21 : vector<1x384xf32> to vector<8x384xf32>
    %25 = arith.addf %23, %24 : vector<8x384xf32>
    %26 = math.tanh %25 : vector<8x384xf32>
    %27 = math.exp %26 : vector<8x384xf32>
    %cst_12 = arith.constant dense<0.000000e+00> : vector<8xf32>
    %28 = vector.multi_reduction <add>, %27, %cst_12 [1] : vector<8x384xf32> to vector<8xf32>
    %29 = vector.shape_cast %28 : vector<8xf32> to vector<8x1xf32>
    %30 = arith.mulf %0, %27 : vector<8x384xf32>
    %31 = tpu.reciprocal %29 : vector<8x1xf32> -> vector<8x1xf32>
    %32 = vector.broadcast %31 : vector<8x1xf32> to vector<8x384xf32>
    %33 = arith.mulf %30, %32 : vector<8x384xf32>
    %c0_13 = arith.constant 0 : index
    %c0_14 = arith.constant 0 : index
    %34 = vector.load %arg4[%c0_13, %c0_14] : memref<8x384xf32, #tpu.memory_space<vmem>>, vector<8x384xf32>
    tpu.vector_store %arg4[%c0_13, %c0_14], %33 {strides = array<i32>} : memref<8x384xf32, #tpu.memory_space<vmem>>, vector<8x384xf32>,
    return
  }
}

</mosaic_0001>

<bundles_post_ra>
// kernel: tpu_custom_call.1
= control target key start
LH: loop header
LB: loop body
LE: loop exit
PB: predicated region body
PF: predicated region fallthrough
CT: control target
= control target key end

     0   :  { %9 = vsyncpa [#allocation3], 0  ;;  %s1144_s0 = inlined_call_operand.hbm [shape: f32[8,384], index: 0, kind: input, shape index: {}]   ;;  %s1145_s1 = inlined_call_operand.hbm [shape: f32[384,384], index: 1, kind: input, shape index: {}]   ;;  %s1146_s2 = inlined_call_operand.vmem [shape: f32[1,384], index: 2, kind: input, shape index: {}]   ;;  %s1147_s3 = inlined_call_operand.vmem [shape: f32[1,384], index: 3, kind: input, shape index: {}]   ;;  %s1148_s4 = inlined_call_operand.hbm [shape: f32[8,384], index: 4, kind: output, shape index: {}]  }
   0x1   :  { %10 = vsyncpa [#allocation6], 0 }
   0x2   :  { %11 = vsyncpa [#allocation4], 0  ;;  %s1010_s15 = smov [#allocation2]   ;;  %s1011_s17 = smov [#allocation5]  }
   0x3   :  { %s18_s16 = sshll.u32 %s1010_s15, 4  ;;  %s27_s18 = sshll.u32 %s1011_s17, 4  ;;  %s19_s16 = int_to_ptr.vmem [resolvable:$true] %s18_s16  ;;  %s1044_s18 = int_to_ptr.vmem [resolvable:$true] %s27_s18 }
   0x4   :  { %s938_s21 = scalar_lea.hbm %s1144_s0, 384 }
   0x5   :  { %p939_p0 = scmp.ne.s32.totalorder %s1144_s0, %s938_s21  ;;  %p942_p1 = scmp.lt.u32.totalorder %s938_s21, %s1144_s0 }
   0x7   :  { %p944_p2 = pnand %p942_p1, %p939_p0 }
   0x9   :  { %947 = shalt.err (!%p944_p2)
}
   0xa   :  { %s948_s26 = scalar_lea.vmem %s19_s16, 384  ;;  %p953_p4 = scmp.lt.s32.totalorder %s19_s16, %s19_s16 }
   0xb   :  { %p949_p3 = scmp.ne.s32.totalorder %s19_s16, %s948_s26  ;;  %p954_p5 = scmp.lt.s32.totalorder %s948_s26, %s948_s26 }
   0xd   :  { %p955_p6 = por %p954_p5, %p953_p4 }
   0xf   :  { %p956_p7 = pnand %p955_p6, %p949_p3 }
  0x11   :  { %959 = shalt.err (!%p956_p7)
}
  0x12   :  { %21 = dma.hbm_to_vmem [thread:$0]  %s1144_s0, 384, %s19_s16, [#allocation3]  }
  0x13   :  { %s960_s5 = scalar_lea.hbm %s1145_s1, 18432 }
  0x14   :  { %p961_p8 = scmp.ne.s32.totalorder %s1145_s1, %s960_s5  ;;  %p964_p9 = scmp.lt.u32.totalorder %s960_s5, %s1145_s1 }
  0x16   :  { %p966_p10 = pnand %p964_p9, %p961_p8 }
  0x18   :  { %969 = shalt.err (!%p966_p10)
}
  0x19   :  { %s970_s10 = scalar_lea.vmem %s1044_s18, 18432  ;;  %p975_p12 = scmp.lt.s32.totalorder %s1044_s18, %s1044_s18 }
  0x1a   :  { %p971_p11 = scmp.ne.s32.totalorder %s1044_s18, %s970_s10  ;;  %p976_p13 = scmp.lt.s32.totalorder %s970_s10, %s970_s10 }
  0x1c   :  { %p977_p0 = por %p976_p13, %p975_p12 }
  0x1e   :  { %p978_p1 = pnand %p977_p0, %p971_p11 }
  0x20   :  { %981 = shalt.err (!%p978_p1)
}
  0x21   :  { %s1012_s0 = smov 384   ;;  %s1013_s11 = smov 24  }
  0x22   :  { %33 = dma.hbm_to_vmem [thread:$0]  %s1145_s1, 18432, %s1044_s18, [#allocation6], %s1012_s0, %s1012_s0, %s1013_s11  }
  0x23   :  { %1004 = dma.done.wait [#allocation3], 384  }
  0x24   :  { %1005 = vsyncadd [#allocation3], 4294966912 }
  0x25   :  { %1006 = dma.done.wait [#allocation6], 18432  }
  0x26   :  { %1007 = vsyncadd [#allocation6], 4294948864  ;;  %v48_v0 = vld [vmem:[#allocation5 + $0x8] sm:$0xff]  ;;  %v51_v1 = vld [vmem:[#allocation5 + $0x20] sm:$0xff]  ;;  %vm1015_vm0 = vmmov 0  }
  0x27   :  { %v97_v2 = vld [vmem:[#allocation5 + $0x190] sm:$0xff]  ;;  %v755_v3 = vpack.c.bf16 %v51_v1, %v48_v0  ;;  %v100_v4 = vld [vmem:[#allocation5 + $0x1a8] sm:$0xff]  ;;  %v47_v5 = vld [vmem:[#allocation5] sm:$0xff] }
  0x28   :  { %v50_v6 = vld [vmem:[#allocation5 + $0x18] sm:$0xff]  ;;  %v851_v7 = vpack.c.bf16 %v100_v4, %v97_v2  ;;  %v49_v9 = vld [vmem:[#allocation5 + $0x10] sm:$0xff]  ;;  %v52_v10 = vld [vmem:[#allocation5 + $0x28] sm:$0xff] }
  0x29   :  { %v757_v8 = vpack.c.bf16 %v50_v6, %v47_v5  ;;  %v54_v11 = vld [vmem:[#allocation5 + $0x38] sm:$0xff]  ;;  %756 = vmatprep.subr.bf16.mxu0 %v755_v3  ;;  %v853_v12 = vpack.c.bf16 %v52_v10, %v49_v9  ;;  %v57_v13 = vld [vmem:[#allocation5 + $0x50] sm:$0xff]  ;;  %v103_v14 = vld [vmem:[#allocation5 + $0x1c0] sm:$0xff] }
  0x2a   :  { %v106_v15 = vld [vmem:[#allocation5 + $0x1d8] sm:$0xff]  ;;  %852 = vmatprep.subr.bf16.mxu1 %v851_v7  ;;  %v759_v16 = vpack.c.bf16 %v57_v13, %v54_v11  ;;  %v53_v18 = vld [vmem:[#allocation5 + $0x30] sm:$0xff]  ;;  %v56_v19 = vld [vmem:[#allocation5 + $0x48] sm:$0xff] }
  0x2b   :  { %758 = vmatpush1.bf16.msra.mxu0 %v757_v8  ;;  %v855_v17 = vpack.c.bf16 %v106_v15, %v103_v14  ;;  %v55_v20 = vld [vmem:[#allocation5 + $0x40] sm:$0xff]  ;;  %854 = vmatpush3.bf16.msra.mxu1 %v853_v12  ;;  %v761_v21 = vpack.c.bf16 %v56_v19, %v53_v18  ;;  %v58_v22 = vld [vmem:[#allocation5 + $0x58] sm:$0xff]  ;;  %v60_v23 = vld [vmem:[#allocation5 + $0x68] sm:$0xff] }
  0x2c   :  { %v63_v24 = vld [vmem:[#allocation5 + $0x80] sm:$0xff]  ;;  %760 = vmatprep.subr.bf16.mxu0 %v759_v16  ;;  %v857_v25 = vpack.c.bf16 %v58_v22, %v55_v20  ;;  %v109_v27 = vld [vmem:[#allocation5 + $0x1f0] sm:$0xff]  ;;  %v112_v28 = vld [vmem:[#allocation5 + $0x208] sm:$0xff] }
  0x2d   :  { %856 = vmatprep.subr.bf16.mxu1 %v855_v17  ;;  %v763_v26 = vpack.c.bf16 %v63_v24, %v60_v23  ;;  %v59_v29 = vld [vmem:[#allocation5 + $0x60] sm:$0xff]  ;;  %v859_v30 = vpack.c.bf16 %v112_v28, %v109_v27  ;;  %v62_v31 = vld [vmem:[#allocation5 + $0x78] sm:$0xff]  ;;  %v61_v32 = vld [vmem:[#allocation5 + $0x70] sm:$0xff] }
  0x2e   :  { %v64_v33 = vld [vmem:[#allocation5 + $0x88] sm:$0xff]  ;;  %v765_v34 = vpack.c.bf16 %v62_v31, %v59_v29  ;;  %v66_v35 = vld [vmem:[#allocation5 + $0x98] sm:$0xff]  ;;  %v69_v36 = vld [vmem:[#allocation5 + $0xb0] sm:$0xff] }
  0x2f   :  { %762 = vmatpush1.bf16.msra.mxu0 %v761_v21  ;;  %v115_v37 = vld [vmem:[#allocation5 + $0x220] sm:$0xff]  ;;  %858 = vmatpush3.bf16.msra.mxu1 %v857_v25  ;;  %v861_v38 = vpack.c.bf16 %v64_v33, %v61_v32  ;;  %v767_v39 = vpack.c.bf16 %v69_v36, %v66_v35  ;;  %v118_v40 = vld [vmem:[#allocation5 + $0x238] sm:$0xff]  ;;  %v65_v41 = vld [vmem:[#allocation5 + $0x90] sm:$0xff] }
  0x30   :  { %764 = vmatprep.subr.bf16.mxu0 %v763_v26  ;;  %v68_v42 = vld [vmem:[#allocation5 + $0xa8] sm:$0xff]  ;;  %860 = vmatprep.subr.bf16.mxu1 %v859_v30  ;;  %v863_v43 = vpack.c.bf16 %v118_v40, %v115_v37  ;;  %v67_v44 = vld [vmem:[#allocation5 + $0xa0] sm:$0xff]  ;;  %v70_v45 = vld [vmem:[#allocation5 + $0xb8] sm:$0xff] }
  0x31   :  { %v72_v46 = vld [vmem:[#allocation5 + $0xc8] sm:$0xff]  ;;  %v75_v47 = vld [vmem:[#allocation5 + $0xe0] sm:$0xff]  ;;  %v121_v48 = vld [vmem:[#allocation5 + $0x250] sm:$0xff]  ;;  %v769_v50 = vpack.c.bf16 %v68_v42, %v65_v41  ;;  %v865_v51 = vpack.c.bf16 %v70_v45, %v67_v44 }
  0x32   :  { %v124_v49 = vld [vmem:[#allocation5 + $0x268] sm:$0xff]  ;;  %v771_v52 = vpack.c.bf16 %v75_v47, %v72_v46  ;;  %v71_v53 = vld [vmem:[#allocation5 + $0xc0] sm:$0xff]  ;;  %v74_v54 = vld [vmem:[#allocation5 + $0xd8] sm:$0xff] }
  0x33   :  { %766 = vmatpush1.bf16.msra.mxu0 %v765_v34  ;;  %862 = vmatpush3.bf16.msra.mxu1 %v861_v38  ;;  %v73_v55 = vld [vmem:[#allocation5 + $0xd0] sm:$0xff]  ;;  %v867_v56 = vpack.c.bf16 %v124_v49, %v121_v48  ;;  %v76_v57 = vld [vmem:[#allocation5 + $0xe8] sm:$0xff]  ;;  %v78_v58 = vld [vmem:[#allocation5 + $0xf8] sm:$0xff]  ;;  %v773_v62 = vpack.c.bf16 %v74_v54, %v71_v53  ;;  %v1014_v49 = vmov 0.0|0.0  }
  0x34   :  { %768 = vmatprep.subr.bf16.mxu0 %v767_v39  ;;  %864 = vmatprep.subr.bf16.mxu1 %v863_v43  ;;  %v81_v59 = vld [vmem:[#allocation5 + $0x110] sm:$0xff]  ;;  %v127_v60 = vld [vmem:[#allocation5 + $0x280] sm:$0xff]  ;;  %v130_v61 = vld [vmem:[#allocation5 + $0x298] sm:$0xff]  ;;  %v869_v63 = vpack.c.bf16 %v76_v57, %v73_v55 }
  0x35   :  { %v775_v0 = vpack.c.bf16 %v81_v59, %v78_v58  ;;  %v77_v1 = vld [vmem:[#allocation5 + $0xf0] sm:$0xff]  ;;  %v80_v2 = vld [vmem:[#allocation5 + $0x108] sm:$0xff]  ;;  %v79_v3 = vld [vmem:[#allocation5 + $0x100] sm:$0xff]  ;;  %v871_v4 = vpack.c.bf16 %v130_v61, %v127_v60 }
  0x36   :  { %v82_v5 = vld [vmem:[#allocation5 + $0x118] sm:$0xff]  ;;  %v84_v6 = vld [vmem:[#allocation5 + $0x128] sm:$0xff]  ;;  %v87_v7 = vld [vmem:[#allocation5 + $0x140] sm:$0xff]  ;;  %v777_v10 = vpack.c.bf16 %v80_v2, %v77_v1 }
  0x37   :  { %770 = vmatpush1.bf16.msra.mxu0 %v769_v50  ;;  %866 = vmatpush3.bf16.msra.mxu1 %v865_v51  ;;  %v133_v8 = vld [vmem:[#allocation5 + $0x2b0] sm:$0xff]  ;;  %v136_v9 = vld [vmem:[#allocation5 + $0x2c8] sm:$0xff]  ;;  %v83_v11 = vld [vmem:[#allocation5 + $0x120] sm:$0xff]  ;;  %v873_v12 = vpack.c.bf16 %v82_v5, %v79_v3  ;;  %v779_v13 = vpack.c.bf16 %v87_v7, %v84_v6 }
  0x38   :  { %772 = vmatprep.subr.bf16.mxu0 %v771_v52  ;;  %868 = vmatprep.subr.bf16.mxu1 %v867_v56  ;;  %v86_v14 = vld [vmem:[#allocation5 + $0x138] sm:$0xff]  ;;  %v85_v15 = vld [vmem:[#allocation5 + $0x130] sm:$0xff]  ;;  %v88_v16 = vld [vmem:[#allocation5 + $0x148] sm:$0xff]  ;;  %v875_v17 = vpack.c.bf16 %v136_v9, %v133_v8 }
  0x39   :  { %v90_v18 = vld [vmem:[#allocation5 + $0x158] sm:$0xff]  ;;  %v93_v19 = vld [vmem:[#allocation5 + $0x170] sm:$0xff]  ;;  %v139_v21 = vld [vmem:[#allocation5 + $0x2e0] sm:$0xff]  ;;  %v781_v23 = vpack.c.bf16 %v86_v14, %v83_v11  ;;  %v877_v24 = vpack.c.bf16 %v88_v16, %v85_v15 }
  0x3a   :  { %v1075_v20 = vld [vmem:[#allocation2 + $0x8] sm:$0xff]  ;;  %v142_v22 = vld [vmem:[#allocation5 + $0x2f8] sm:$0xff]  ;;  %v783_v25 = vpack.c.bf16 %v93_v19, %v90_v18  ;;  %v92_v27 = vld [vmem:[#allocation5 + $0x168] sm:$0xff] }
  0x3b   :  { %774 = vmatpush1.bf16.msra.mxu0 %v773_v62  ;;  %870 = vmatpush3.bf16.msra.mxu1 %v869_v63  ;;  %v89_v26 = vld [vmem:[#allocation5 + $0x150] sm:$0xff]  ;;  %v91_v28 = vld [vmem:[#allocation5 + $0x160] sm:$0xff]  ;;  %v879_v29 = vpack.c.bf16 %v142_v22, %v139_v21  ;;  %v94_v30 = vld [vmem:[#allocation5 + $0x178] sm:$0xff]  ;;  %v1016_v62 = vmov 0.0  }
  0x3c   :  { %776 = vmatprep.subr.bf16.mxu0 %v775_v0  ;;  %872 = vmatprep.subr.bf16.mxu1 %v871_v4  ;;  %v96_v31 = vld [vmem:[#allocation5 + $0x188] sm:$0xff]  ;;  %v99_v32 = vld [vmem:[#allocation5 + $0x1a0] sm:$0xff]  ;;  %v785_v33 = vpack.c.bf16 %v92_v27, %v89_v26  ;;  %v881_v34 = vpack.c.bf16 %v94_v30, %v91_v28  ;;  %v98_v37 = vld [vmem:[#allocation5 + $0x198] sm:$0xff] }
  0x3d   :  { %397 = vmatprep.mubr.f32.mxu1 %v1075_v20  ;;  %255 = vmatprep.mubr.f32.mxu0 %v1075_v20  ;;  %v787_v35 = vpack.c.bf16 %v99_v32, %v96_v31  ;;  %v95_v36 = vld [vmem:[#allocation5 + $0x180] sm:$0xff]  ;;  %v145_v38 = vld [vmem:[#allocation5 + $0x310] sm:$0xff]  ;;  %v148_v39 = vld [vmem:[#allocation5 + $0x328] sm:$0xff] }
  0x3e   :  { %v102_v40 = vld [vmem:[#allocation5 + $0x1b8] sm:$0xff]  ;;  %v105_v41 = vld [vmem:[#allocation5 + $0x1d0] sm:$0xff]  ;;  %v789_v42 = vpack.c.bf16 %v98_v37, %v95_v36  ;;  %v1079_v43 = vld [vmem:[#allocation2] sm:$0xff]  ;;  %v884_v44 = vpack.c.bf16 %v148_v39, %v145_v38 }
  0x3f   :  { %778 = vmatpush1.bf16.msra.mxu0 %v777_v10  ;;  %874 = vmatpush3.bf16.msra.mxu1 %v873_v12  ;;  %v791_v45 = vpack.c.bf16 %v105_v41, %v102_v40  ;;  %v101_v46 = vld [vmem:[#allocation5 + $0x1b0] sm:$0xff]  ;;  %v104_v47 = vld [vmem:[#allocation5 + $0x1c8] sm:$0xff]  ;;  %v151_v48 = vld [vmem:[#allocation5 + $0x340] sm:$0xff] }
  0x40   :  { %780 = vmatprep.subr.bf16.mxu0 %v779_v13  ;;  %876 = vmatprep.subr.bf16.mxu1 %v875_v17  ;;  %v154_v50 = vld [vmem:[#allocation5 + $0x358] sm:$0xff]  ;;  %v108_v51 = vld [vmem:[#allocation5 + $0x1e8] sm:$0xff]  ;;  %v111_v52 = vld [vmem:[#allocation5 + $0x200] sm:$0xff]  ;;  %v793_v53 = vpack.c.bf16 %v104_v47, %v101_v46 }
  0x41   :  { %v887_v54 = vpack.c.bf16 %v154_v50, %v151_v48  ;;  %v795_v55 = vpack.c.bf16 %v111_v52, %v108_v51  ;;  %v107_v56 = vld [vmem:[#allocation5 + $0x1e0] sm:$0xff]  ;;  %v110_v57 = vld [vmem:[#allocation5 + $0x1f8] sm:$0xff]  ;;  %v157_v58 = vld [vmem:[#allocation5 + $0x370] sm:$0xff] }
  0x42   :  { %v160_v59 = vld [vmem:[#allocation5 + $0x388] sm:$0xff]  ;;  %v114_v60 = vld [vmem:[#allocation5 + $0x218] sm:$0xff]  ;;  %v117_v61 = vld [vmem:[#allocation5 + $0x230] sm:$0xff]  ;;  %v797_v63 = vpack.c.bf16 %v110_v57, %v107_v56 }
  0x43   :  { %782 = vmatpush1.bf16.msra.mxu0 %v781_v23  ;;  %878 = vmatpush3.bf16.msra.mxu1 %v877_v24  ;;  %v890_v0 = vpack.c.bf16 %v160_v59, %v157_v58  ;;  %v799_v1 = vpack.c.bf16 %v117_v61, %v114_v60  ;;  %v113_v2 = vld [vmem:[#allocation5 + $0x210] sm:$0xff]  ;;  %v116_v3 = vld [vmem:[#allocation5 + $0x228] sm:$0xff]  ;;  %v163_v4 = vld [vmem:[#allocation5 + $0x3a0] sm:$0xff] }
  0x44   :  { %784 = vmatprep.subr.bf16.mxu0 %v783_v25  ;;  %880 = vmatprep.subr.bf16.mxu1 %v879_v29  ;;  %v166_v5 = vld [vmem:[#allocation5 + $0x3b8] sm:$0xff]  ;;  %v120_v6 = vld [vmem:[#allocation5 + $0x248] sm:$0xff]  ;;  %v123_v7 = vld [vmem:[#allocation5 + $0x260] sm:$0xff]  ;;  %v801_v8 = vpack.c.bf16 %v116_v3, %v113_v2 }
  0x45   :  { %v893_v9 = vpack.c.bf16 %v166_v5, %v163_v4  ;;  %v803_v10 = vpack.c.bf16 %v123_v7, %v120_v6  ;;  %v119_v11 = vld [vmem:[#allocation5 + $0x240] sm:$0xff]  ;;  %v122_v12 = vld [vmem:[#allocation5 + $0x258] sm:$0xff]  ;;  %v169_v13 = vld [vmem:[#allocation5 + $0x3d0] sm:$0xff] }
  0x46   :  { %v172_v14 = vld [vmem:[#allocation5 + $0x3e8] sm:$0xff]  ;;  %v126_v15 = vld [vmem:[#allocation5 + $0x278] sm:$0xff]  ;;  %v129_v16 = vld [vmem:[#allocation5 + $0x290] sm:$0xff]  ;;  %v805_v17 = vpack.c.bf16 %v122_v12, %v119_v11 }
  0x47   :  { %786 = vmatpush1.bf16.msra.mxu0 %v785_v33  ;;  %882 = vmatpush3.bf16.msra.mxu1 %v881_v34  ;;  %v896_v18 = vpack.c.bf16 %v172_v14, %v169_v13  ;;  %v807_v19 = vpack.c.bf16 %v129_v16, %v126_v15  ;;  %v125_v21 = vld [vmem:[#allocation5 + $0x270] sm:$0xff]  ;;  %v128_v22 = vld [vmem:[#allocation5 + $0x288] sm:$0xff]  ;;  %v175_v23 = vld [vmem:[#allocation5 + $0x400] sm:$0xff] }
  0x48   :  { %788 = vmatprep.subr.bf16.mxu0 %v787_v35  ;;  %883 = vmatprep.subr.bf16.mxu1 %v1014_v49  ;;  %v178_v24 = vld [vmem:[#allocation5 + $0x418] sm:$0xff]  ;;  %v132_v25 = vld [vmem:[#allocation5 + $0x2a8] sm:$0xff]  ;;  %v135_v26 = vld [vmem:[#allocation5 + $0x2c0] sm:$0xff]  ;;  %v809_v27 = vpack.c.bf16 %v128_v22, %v125_v21 }
  0x49   :  { %v899_v28 = vpack.c.bf16 %v178_v24, %v175_v23  ;;  %v811_v29 = vpack.c.bf16 %v135_v26, %v132_v25  ;;  %v131_v30 = vld [vmem:[#allocation5 + $0x2a0] sm:$0xff]  ;;  %v134_v31 = vld [vmem:[#allocation5 + $0x2b8] sm:$0xff]  ;;  %v181_v32 = vld [vmem:[#allocation5 + $0x430] sm:$0xff] }
  0x4a   :  { %398 = vmatmul.mubr.f32.vlgmr.msra.gmra.mrb[0].mxu1 %v1079_v43  ;;  %v184_v33 = vld [vmem:[#allocation5 + $0x448] sm:$0xff]  ;;  %v138_v34 = vld [vmem:[#allocation5 + $0x2d8] sm:$0xff]  ;;  %v141_v35 = vld [vmem:[#allocation5 + $0x2f0] sm:$0xff]  ;;  %v813_v36 = vpack.c.bf16 %v134_v31, %v131_v30 }
  0x4b   :  { %790 = vmatpush1.bf16.msra.mxu0 %v789_v42  ;;  %885 = vmatpush3.bf16.msra.mxu1 %v884_v44  ;;  %v902_v37 = vpack.c.bf16 %v184_v33, %v181_v32  ;;  %v815_v38 = vpack.c.bf16 %v141_v35, %v138_v34  ;;  %v137_v39 = vld [vmem:[#allocation5 + $0x2d0] sm:$0xff]  ;;  %v140_v40 = vld [vmem:[#allocation5 + $0x2e8] sm:$0xff]  ;;  %v187_v41 = vld [vmem:[#allocation5 + $0x460] sm:$0xff] }
  0x4c   :  { %792 = vmatprep.subr.bf16.mxu0 %v791_v45  ;;  %886 = vmatprep.subr.bf16.mxu1 %v1014_v49  ;;  %v190_v42 = vld [vmem:[#allocation5 + $0x478] sm:$0xff]  ;;  %v144_v44 = vld [vmem:[#allocation5 + $0x308] sm:$0xff]  ;;  %v147_v45 = vld [vmem:[#allocation5 + $0x320] sm:$0xff]  ;;  %v817_v46 = vpack.c.bf16 %v140_v40, %v137_v39 }
  0x4d   :  { %752 = vmatprep.mubr.msk.f32.mxu1 %vm1015_vm0, %v1016_v62  ;;  %v905_v47 = vpack.c.bf16 %v190_v42, %v187_v41  ;;  %v819_v48 = vpack.c.bf16 %v147_v45, %v144_v44  ;;  %v143_v50 = vld [vmem:[#allocation5 + $0x300] sm:$0xff]  ;;  %v146_v51 = vld [vmem:[#allocation5 + $0x318] sm:$0xff]  ;;  %v149_v57 = vld [vmem:[#allocation5 + $0x330] sm:$0xff] }
  0x4e   :  { %v150_v52 = vld [vmem:[#allocation5 + $0x338] sm:$0xff]  ;;  %v152_v58 = vld [vmem:[#allocation5 + $0x348] sm:$0xff]  ;;  %v159_v60 = vld [vmem:[#allocation5 + $0x380] sm:$0xff] }
  0x4f   :  { %794 = vmatpush1.bf16.msra.mxu0 %v793_v53  ;;  %888 = vmatpush3.bf16.msra.mxu1 %v887_v54  ;;  %v153_v53 = vld [vmem:[#allocation5 + $0x350] sm:$0xff]  ;;  %v821_v54 = vpack.c.bf16 %v146_v51, %v143_v50  ;;  %v156_v59 = vld [vmem:[#allocation5 + $0x368] sm:$0xff]  ;;  %v825_v61 = vpack.c.bf16 %v152_v58, %v149_v57  ;;  %v167_v11 = vld [vmem:[#allocation5 + $0x3c0] sm:$0xff] }
  0x50   :  { %796 = vmatprep.subr.bf16.mxu0 %v795_v55  ;;  %889 = vmatprep.subr.bf16.mxu1 %v1014_v49  ;;  %v1091_v55 = vld [vmem:[#allocation2 + $0x10] sm:$0xff]  ;;  %v823_v56 = vpack.c.bf16 %v153_v53, %v150_v52  ;;  %v165_v2 = vld [vmem:[#allocation5 + $0x3b0] sm:$0xff]  ;;  %v164_v6 = vld [vmem:[#allocation5 + $0x3a8] sm:$0xff] }
  0x51   :  { %v161_v5 = vld [vmem:[#allocation5 + $0x390] sm:$0xff]  ;;  %v168_v7 = vld [vmem:[#allocation5 + $0x3c8] sm:$0xff]  ;;  %v170_v12 = vld [vmem:[#allocation5 + $0x3d8] sm:$0xff] }
  0x52   :  { %v174_v13 = vld [vmem:[#allocation5 + $0x3f8] sm:$0xff]  ;;  %v177_v14 = vld [vmem:[#allocation5 + $0x410] sm:$0xff]  ;;  %v179_v23 = vld [vmem:[#allocation5 + $0x420] sm:$0xff] }
  0x53   :  { %798 = vmatpush1.bf16.msra.mxu0 %v797_v63  ;;  %891 = vmatpush3.bf16.msra.mxu1 %v890_v0  ;;  %v155_v63 = vld [vmem:[#allocation5 + $0x360] sm:$0xff]  ;;  %v158_v0 = vld [vmem:[#allocation5 + $0x378] sm:$0xff]  ;;  %v839_v15 = vpack.c.bf16 %v177_v14, %v174_v13  ;;  %v173_v16 = vld [vmem:[#allocation5 + $0x3f0] sm:$0xff] }
  0x54   :  { %800 = vmatprep.subr.bf16.mxu0 %v799_v1  ;;  %892 = vmatprep.subr.bf16.mxu1 %v1014_v49  ;;  %v162_v1 = vld [vmem:[#allocation5 + $0x398] sm:$0xff]  ;;  %v829_v3 = vpack.c.bf16 %v158_v0, %v155_v63  ;;  %v189_v26 = vld [vmem:[#allocation5 + $0x470] sm:$0xff]  ;;  %v188_v30 = vld [vmem:[#allocation5 + $0x468] sm:$0xff] }
  0x55   :  { %v831_v4 = vpack.c.bf16 %v165_v2, %v162_v1  ;;  %v182_v24 = vld [vmem:[#allocation5 + $0x438] sm:$0xff] }
  0x56   :  { %v186_v25 = vld [vmem:[#allocation5 + $0x458] sm:$0xff] }
  0x57   :  { %802 = vmatpush1.bf16.msra.mxu0 %v801_v8  ;;  %894 = vmatpush3.bf16.msra.mxu1 %v893_v9  ;;  %v171_v8 = vld [vmem:[#allocation5 + $0x3e0] sm:$0xff]  ;;  %v833_v9 = vpack.c.bf16 %v164_v6, %v161_v5 }
  0x58   :  { %804 = vmatprep.subr.bf16.mxu0 %v803_v10  ;;  %895 = vmatprep.subr.bf16.mxu1 %v1014_v49  ;;  %v835_v10 = vpack.c.bf16 %v171_v8, %v168_v7 }
  0x5b   :  { %806 = vmatpush1.bf16.msra.mxu0 %v805_v17  ;;  %897 = vmatpush3.bf16.msra.mxu1 %v896_v18  ;;  %v176_v17 = vld [vmem:[#allocation5 + $0x408] sm:$0xff] }
  0x5c   :  { %808 = vmatprep.subr.bf16.mxu0 %v807_v19  ;;  %898 = vmatprep.subr.bf16.mxu1 %v1014_v49  ;;  %v180_v18 = vld [vmem:[#allocation5 + $0x428] sm:$0xff]  ;;  %v183_v19 = vld [vmem:[#allocation5 + $0x440] sm:$0xff]  ;;  %v841_v21 = vpack.c.bf16 %v176_v17, %v173_v16 }
  0x5d   :  { %v843_v22 = vpack.c.bf16 %v183_v19, %v180_v18 }
  0x5f   :  { %810 = vmatpush1.bf16.msra.mxu0 %v809_v27  ;;  %900 = vmatpush3.bf16.msra.mxu1 %v899_v28  ;;  %v845_v27 = vpack.c.bf16 %v182_v24, %v179_v23  ;;  %v847_v28 = vpack.c.bf16 %v189_v26, %v186_v25 }
  0x60   :  { %812 = vmatprep.subr.bf16.mxu0 %v811_v29  ;;  %901 = vmatprep.subr.bf16.mxu1 %v1014_v49  ;;  %v185_v29 = vld [vmem:[#allocation5 + $0x450] sm:$0xff] }
  0x61   :  { %v849_v31 = vpack.c.bf16 %v188_v30, %v185_v29 }
  0x63   :  { %814 = vmatpush1.bf16.msra.mxu0 %v813_v36  ;;  %903 = vmatpush3.bf16.msra.mxu1 %v902_v37 }
  0x64   :  { %816 = vmatprep.subr.bf16.mxu0 %v815_v38  ;;  %904 = vmatprep.subr.bf16.mxu1 %v1014_v49  ;;  %v827_v49 = vpack.c.bf16 %v159_v60, %v156_v59 }
  0x67   :  { %818 = vmatpush1.bf16.msra.mxu0 %v817_v46  ;;  %906 = vmatpush3.bf16.msra.mxu1 %v905_v47 }
  0x68   :  { %820 = vmatprep.subr.bf16.mxu0 %v819_v48 }
  0x6a   :  { %256 = vmatmul.mubr.f32.vlgmr.msra.gmra.mrb[0].mxu0 %v1079_v43  ;;  %753 = vmatmul.mubr.f32.vlgmr.msra.gmra.mrb[2].mxu1 %v1091_v55 }
  0x6b   :  { %822 = vmatpush1.bf16.msra.mxu0 %v821_v54  ;;  %326 = vmatprep.mubr.f32.mxu0 %v1016_v62  ;;  %v837_v62 = vpack.c.bf16 %v170_v12, %v167_v11 }
  0x6c   :  { %824 = vmatprep.subr.bf16.mxu0 %v823_v56 }
  0x6f   :  { %826 = vmatpush1.bf16.msra.mxu0 %v825_v61 }
  0x70   :  { %828 = vmatprep.subr.bf16.mxu0 %v827_v49 }
  0x73   :  { %830 = vmatpush1.bf16.msra.mxu0 %v829_v3 }
  0x74   :  { %832 = vmatprep.subr.bf16.mxu0 %v831_v4 }
  0x77   :  { %834 = vmatpush1.bf16.msra.mxu0 %v833_v9 }
  0x78   :  { %836 = vmatprep.subr.bf16.mxu0 %v835_v10 }
  0x7b   :  { %838 = vmatpush1.bf16.msra.mxu0 %v837_v62 }
  0x7c   :  { %840 = vmatprep.subr.bf16.mxu0 %v839_v15 }
  0x7f   :  { %842 = vmatpush1.bf16.msra.mxu0 %v841_v21 }
  0x80   :  { %844 = vmatprep.subr.bf16.mxu0 %v843_v22 }
  0x83   :  { %846 = vmatpush1.bf16.msra.mxu0 %v845_v27 }
  0x84   :  { %848 = vmatprep.subr.bf16.mxu0 %v847_v28 }
  0x87   :  { %850 = vmatpush1.bf16.msra.mxu0 %v849_v31 }
  0x8a   :  { %327 = vmatmul.mubr.f32.vlgmr.msra.gmra.mrb[0].mxu0 %v1091_v55 }
 0x11d   :  { %v700_v32 = vpop.f32.mrb[0].mxu1 }
 0x11e   :  { %v701_v33 = vpop.f32.mrb[1].mxu1 }
 0x11f   :  { %v702_v34 = vadd.f32 %v701_v33, %v700_v32  ;;  %v1017_v33 = vmov 1966171168  }
 0x13d   :  { %v469_v35 = vpop.f32.mrb[2].mxu1 }
 0x13e   :  { %v1097_v36 = vadd.f32 %v702_v34, %v469_v35  ;;  %v754_v37 = vpop.f32.mrb[3].mxu1  ;;  %v536_v34 = vunpack.c.l.s4 %v1017_v33  ;;  %v538_v35 = vlaneseq }
 0x140   :  { %v485_v38 = vrot.slane %v1097_v36, 4  ;;  %v496_v39 = vmul.f32 %v1097_v36, %v1097_v36  ;;  %v537_v37 = vunpack.c.0.s8 %v536_v34 }
 0x142   :  { %v486_v40 = vadd.f32 %v485_v38, %v1097_v36  ;;  %v509_v41 = vrot.slane %v496_v39, 4  ;;  %v539_v38 = vshrl.u32 %v538_v35, 7 }
 0x144   :  { %v487_v42 = vrot.slane %v486_v40, 2  ;;  %v510_v44 = vadd.f32 %v509_v41, %v496_v39  ;;  %v540_v41 = vsub.s32 %v537_v37, %v539_v38 }
 0x146   :  { %v488_v45 = vadd.f32 %v487_v42, %v486_v40  ;;  %v511_v46 = vrot.slane %v510_v44, 2 }
 0x148   :  { %v489_v47 = vrot.slane %v488_v45, 1  ;;  %v512_v48 = vadd.f32 %v511_v46, %v510_v44 }
 0x14a   :  { %v490_v50 = vadd.f32 %v489_v47, %v488_v45  ;;  %v513_v51 = vrot.slane %v512_v48, 1 }
 0x14c   :  { %v1114_v61 = vmul.f32 0.125, %v490_v50  ;;  %v514_v49 = vadd.f32 %v513_v51, %v512_v48  ;;  %v524_v48 = vld [vmem:[%s1146_s2] sm:$0x7]  ;;  %v563_v51 = vsub.s32 0, %v539_v38 }
 0x14e   :  { %v517_v7 = vmul.f32 0.125, %v514_v49  ;;  %v520_v8 = vmul.f32 %v1114_v61, %v1114_v61 }
 0x150   :  { %v523_v16 = vsub.f32 %v517_v7, %v520_v8  ;;  %v559_v8 = vld [vmem:[%s1147_s3] sm:$0x7]  ;;  %s1018_s3 = smov [#allocation7]  }
 0x151   :  { %s658_s16 = sshll.u32 %s1018_s3, 4  ;;  %s659_s16 = int_to_ptr.vmem [resolvable:$true] %s658_s16 }
 0x152   :  { %v527_v26 = vadd.f32 1e-05, %v523_v16  ;;  %s982_s17 = scalar_lea.vmem %s659_s16, 384  ;;  %p987_p3 = scmp.lt.s32.totalorder %s659_s16, %s659_s16 }
 0x153   :  { %p983_p2 = scmp.ne.s32.totalorder %s659_s16, %s982_s17  ;;  %p988_p4 = scmp.lt.s32.totalorder %s982_s17, %s982_s17 }
 0x154   :  { %918 = vrsqrt.f32 %v527_v26 }
 0x155   :  { %p989_p5 = por %p988_p4, %p987_p3 }
 0x157   :  { %p990_p6 = pnand %p989_p5, %p983_p2 }
 0x15d   :  { %v1103_v52 = vpop.f32.mrb[0].mxu0 }
 0x15e   :  { %v473_v53 = vrot.slane %v1103_v52, 4  ;;  %v494_v54 = vmul.f32 %v1103_v52, %v1103_v52  ;;  %v1108_v56 = vpop.f32.mrb[1].mxu0  ;;  %v919_v39 = vpop.eup %918 }
 0x15f   :  { %v479_v57 = vrot.slane %v1108_v56, 4  ;;  %v495_v58 = vmul.f32 %v1108_v56, %v1108_v56  ;;  %v548_v46 = vrot.slane %v919_v39, %v540_v41 }
 0x160   :  { %v474_v59 = vadd.f32 %v473_v53, %v1103_v52  ;;  %v497_v60 = vrot.slane %v494_v54, 4  ;;  %v567_v53 = vsub.s32 1, %v539_v38 }
 0x161   :  { %v480_v63 = vadd.f32 %v479_v57, %v1108_v56  ;;  %v503_v0 = vrot.slane %v495_v58, 4 }
 0x162   :  { %v475_v1 = vrot.slane %v474_v59, 2  ;;  %v498_v2 = vadd.f32 %v497_v60, %v494_v54  ;;  %v571_v54 = vsub.s32 2, %v539_v38 }
 0x163   :  { %v481_v3 = vrot.slane %v480_v63, 2  ;;  %v504_v4 = vadd.f32 %v503_v0, %v495_v58 }
 0x164   :  { %v476_v5 = vadd.f32 %v475_v1, %v474_v59  ;;  %v499_v6 = vrot.slane %v498_v2, 2 }
 0x165   :  { %v482_v9 = vadd.f32 %v481_v3, %v480_v63  ;;  %v505_v10 = vrot.slane %v504_v4, 2 }
 0x166   :  { %v477_v11 = vrot.slane %v476_v5, 1  ;;  %v500_v12 = vadd.f32 %v499_v6, %v498_v2 }
 0x167   :  { %v483_v13 = vrot.slane %v482_v9, 1  ;;  %v506_v14 = vadd.f32 %v505_v10, %v504_v4 }
 0x168   :  { %v478_v62 = vadd.f32 %v477_v11, %v476_v5  ;;  %v501_v15 = vrot.slane %v500_v12, 1 }
 0x169   :  { %v484_v17 = vadd.f32 %v483_v13, %v482_v9  ;;  %v507_v18 = vrot.slane %v506_v14, 1 }
 0x16a   :  { %v491_v19 = vmul.f32 0.125, %v478_v62  ;;  %v502_v21 = vadd.f32 %v501_v15, %v500_v12 }
 0x16b   :  { %v492_v22 = vmul.f32 0.125, %v484_v17  ;;  %v508_v23 = vadd.f32 %v507_v18, %v506_v14 }
 0x16c   :  { %v515_v24 = vmul.f32 0.125, %v502_v21  ;;  %v518_v25 = vmul.f32 %v491_v19, %v491_v19 }
 0x16d   :  { %v516_v27 = vmul.f32 0.125, %v508_v23  ;;  %v519_v28 = vmul.f32 %v492_v22, %v492_v22 }
 0x16e   :  { %v521_v29 = vsub.f32 %v515_v24, %v518_v25 }
 0x16f   :  { %v522_v30 = vsub.f32 %v516_v27, %v519_v28 }
 0x170   :  { %v525_v31 = vadd.f32 1e-05, %v521_v29 }
 0x171   :  { %v526_v32 = vadd.f32 1e-05, %v522_v30 }
 0x172   :  { %920 = vrsqrt.f32 %v525_v31 }
 0x173   :  { %922 = vrsqrt.f32 %v526_v32 }
 0x17c   :  { %v921_v40 = vpop.eup %920 }
 0x17d   :  { %v923_v42 = vpop.eup %922 }
 0x17e   :  { %v534_v44 = vcombine.low %v921_v40, %v923_v42 }
 0x180   :  { %v541_v45 = vrot.slane %v534_v44, %v540_v41 }
 0x182   :  { %v549_v47 = vcombine.low %v541_v45, %v548_v46 }
 0x184   :  { %v556_v50 = vrot.slane %v549_v47, %v540_v41 }
 0x186   :  { %v558_v57 = vmul.f32 %v556_v50, %v524_v48 }
 0x188   :  { %v564_v58 = vrot.slane %v558_v57, %v563_v51  ;;  %v568_v59 = vrot.slane %v558_v57, %v567_v53  ;;  %v572_v60 = vrot.slane %v558_v57, %v571_v54 }
 0x18a   :  { %v576_v49 = vmul.f32 %v564_v58, %v491_v19  ;;  %v577_v63 = vmul.f32 %v568_v59, %v492_v22  ;;  %v578_v0 = vmul.f32 %v572_v60, %v1114_v61  ;;  %v607_v1 = vmul.f32 %v564_v58, %v1103_v52 }
 0x18b   :  { %v608_v2 = vmul.f32 %v568_v59, %v1108_v56  ;;  %v609_v3 = vmul.f32 %v572_v60, %v1097_v36 }
 0x18c   :  { %v582_v4 = vcombine.low %v576_v49, %v577_v63  ;;  %v596_v6 = vrot.slane %v578_v0, %v540_v41 }
 0x18e   :  { %v589_v5 = vrot.slane %v582_v4, %v540_v41 }
 0x190   :  { %v597_v7 = vcombine.low %v589_v5, %v596_v6 }
 0x192   :  { %v604_v9 = vrot.slane %v597_v7, %v540_v41 }
 0x194   :  { %v606_v10 = vsub.f32 %v559_v8, %v604_v9 }
 0x196   :  { %v614_v11 = vrot.slane %v606_v10, %v563_v51  ;;  %v618_v12 = vrot.slane %v606_v10, %v567_v53  ;;  %v622_v13 = vrot.slane %v606_v10, %v571_v54 }
 0x198   :  { %v627_v61 = vadd.f32 %v618_v12, %v608_v2  ;;  %v626_v14 = vadd.f32 %v614_v11, %v607_v1  ;;  %v628_v52 = vadd.f32 %v622_v13, %v609_v3 }
 0x19a   :  { %924 = vtanh.f32 %v627_v61 }
 0x19b   :  { %926 = vtanh.f32 %v626_v14 }
 0x19c   :  { %928 = vtanh.f32 %v628_v52 }
 0x1a4   :  { %v925_v36 = vpop.eup %924 }
 0x1a5   :  { %v927_v56 = vpop.eup %926  ;;  %v634_v62 = vmul.f32 1.442695, %v925_v36 }
 0x1a6   :  { %v929_v15 = vpop.eup %928  ;;  %v632_v16 = vmul.f32 1.442695, %v927_v56 }
 0x1a7   :  { %930 = vpow2.f32 %v634_v62  ;;  %v636_v17 = vmul.f32 1.442695, %v929_v15 }
 0x1a8   :  { %932 = vpow2.f32 %v632_v16 }
 0x1a9   :  { %934 = vpow2.f32 %v636_v17 }
 0x1b1   :  { %v931_v18 = vpop.eup %930 }
 0x1b2   :  { %v933_v19 = vpop.eup %932  ;;  %v643_v26 = vmul.f32 %v931_v18, %v1075_v20 }
 0x1b3   :  { %v638_v21 = vadd.f32 %v933_v19, %v931_v18  ;;  %v935_v22 = vpop.eup %934  ;;  %v642_v25 = vmul.f32 %v933_v19, %v1079_v43 }
 0x1b4   :  { %v644_v27 = vmul.f32 %v935_v22, %v1091_v55 }
 0x1b5   :  { %v639_v23 = vadd.f32 %v935_v22, %v638_v21 }
 0x1b7   :  { %640 = vadd.xlane.f32.xlu0 %v639_v23 }
 0x244   :  { %v641_v24 = vpop.xlane.xlu0 %640 }
 0x245   :  { %936 = vrcp.f32 %v641_v24 }
 0x24f   :  { %v937_v28 = vpop.eup %936 }
 0x250   :  { %v646_v29 = vmul.f32 %v937_v28, %v642_v25  ;;  %v647_v30 = vmul.f32 %v937_v28, %v643_v26  ;;  %v648_v31 = vmul.f32 %v937_v28, %v644_v27 }
 0x252   :  { %649 = vst [vmem:[#allocation7] sm:$0xff] %v646_v29  ;;  %650 = vst [vmem:[#allocation7 + $0x8] sm:$0xff] %v647_v30 }
 0x253   :  { %651 = vst [vmem:[#allocation7 + $0x10] sm:$0xff] %v648_v31 }
 0x254   :  { %993 = shalt.err (!%p990_p6)
}
 0x255   :  { %s994_s20 = scalar_lea.hbm %s1148_s4, 384 }
 0x256   :  { %p995_p7 = scmp.ne.s32.totalorder %s1148_s4, %s994_s20  ;;  %p998_p8 = scmp.lt.u32.totalorder %s994_s20, %s1148_s4 }
 0x258   :  { %p1000_p9 = pnand %p998_p8, %p995_p7 }
 0x25a   :  { %1003 = shalt.err (!%p1000_p9)
}
 0x25b   :  { %661 = dma.vmem_to_hbm [thread:$0]  %s659_s16, 384, %s1148_s4, [#allocation4]  }
 0x25c   :  { %1008 = dma.done.wait [#allocation4], 384  }
 0x25d   :  { %1009 = vsyncadd [#allocation4], 4294966912 }
 0x25e   :  { %665 = vsyncpa [#allocation3], 1 }
 0x25f   :  { %666 = vsyncpa [#allocation6], 1 }
 0x260   :  { %667 = vsyncpa [#allocation4], 1 }

</bundles_post_ra>
